<compile_context>
chip_gen: v7x
topology: tpu7x:2x2x1
jax: 0.10.0
libtpu: 0.0.40
codegen_flags: <defaults>
</compile_context>

<pallas_src>
import functools

import jax
import jax.numpy as jnp
from jax import lax
from jax.experimental import pallas as pl
from jax.experimental.pallas import tpu as pltpu

EPS = 1e-5


# ---------------------------------------------------------------------------
# Generation-aware configuration + small helpers
# ---------------------------------------------------------------------------

@functools.lru_cache(maxsize=None)
def _chip_config():
    """Returns (vmem_limit_bytes, use_im2col) tuned per TPU generation."""
    try:
        kind = jax.devices()[0].device_kind.lower()
    except Exception:
        kind = ""
    is_v7 = ("v7" in kind) or ("7x" in kind)
    is_v6 = "v6" in kind
    is_v5 = "v5" in kind
    if is_v7:
        vmem = 48 * 1024 * 1024      # 64 MiB physical per TC on v7x
    elif is_v6 or is_v5:
        vmem = 100 * 1024 * 1024     # 128 MiB physical on v5e/v6e
    else:
        vmem = 64 * 1024 * 1024      # unknown generation: stay conservative
    # im2col (single K=9*C matmul) only pays on v6e's 256-deep MXU; on v7x the
    # MRB accumulates in place and on v5e the 128-wide MXU is already full per
    # tap, so the (TILE, 9*C) concat is pure vld/vst overhead there.
    return vmem, is_v6


def _pad128(c):
    return ((c + 127) // 128) * 128


def _pad_to(a, *target):
    pads = tuple((0, t - s) for s, t in zip(a.shape, target))
    if any(p for _, p in pads):
        a = jnp.pad(a, pads)
    return a


def _pick_row_tile(rows, target=1024):
    """Largest multiple-of-8 divisor of `rows` that is <= target."""
    if rows <= target:
        return rows
    best = None
    for t in range(8, target + 1, 8):
        if rows % t == 0:
            best = t
    return best if best is not None else rows


def _pick_conv_tile(H, W, target=512):
    """Largest k*W (k divides H, k*W % 8 == 0) <= target; falls back to H*W."""
    best = None
    for k in range(1, H + 1):
        if H % k:
            continue
        t = k * W
        if t > target:
            break
        if t % 8 == 0:
            best = t
    return best if best is not None else H * W


# ---------------------------------------------------------------------------
# Kernels
# ---------------------------------------------------------------------------

def _conv1x1_stats_kernel(x_ref, w_ref, y_ref, s_ref, m2_ref, *, mm_dtype):
    """1x1 conv (channel matmul) over a row tile + centered BN partials."""
    x = x_ref[...].astype(mm_dtype)                                   # (TP, Cin)
    y = jnp.dot(x, w_ref[...], preferred_element_type=jnp.float32)    # (TP, C)
    y_ref[...] = y.astype(y_ref.dtype)
    s = jnp.sum(y, axis=0, keepdims=True)
    dev = y - s * (1.0 / y.shape[0])
    s_ref[0] = s
    m2_ref[0] = jnp.sum(dev * dev, axis=0, keepdims=True)


def _bn_conv1x1_stats_kernel(y_ref, sc_ref, sh_ref, w_ref, o_ref, s_ref, m2_ref,
                             *, mm_dtype):
    """Apply previous BN (scale/shift) + ReLU, then 1x1 conv + centered partials."""
    y = y_ref[...].astype(jnp.float32) * sc_ref[...] + sh_ref[...]
    y = jnp.maximum(y, 0.0)
    o = jnp.dot(y.astype(mm_dtype), w_ref[...], preferred_element_type=jnp.float32)
    o_ref[...] = o.astype(o_ref.dtype)
    s = jnp.sum(o, axis=0, keepdims=True)
    dev = o - s * (1.0 / o.shape[0])
    s_ref[0] = s
    m2_ref[0] = jnp.sum(dev * dev, axis=0, keepdims=True)


def _bn_conv3x3_stats_kernel(y_ref, sc_ref, sh_ref, w_ref, o_ref, s_ref, m2_ref,
                             pad_ref, *, H, W, PADR, TILE, im2col):
    """BN1 + ReLU, then 3x3 / stride-1 / pad-1 conv over one image.

    The normalized activation is written into a zero-padded VMEM scratch so the
    nine taps become sublane-shifted slices (no roll copies).  The conv then
    runs over row tiles via lax.fori_loop so f32 / im2col temporaries are
    bounded per tile.  Vertical out-of-image taps read the zero halo,
    horizontal ones use two hoisted (TILE, 1) column-validity masks.
    """
    PI = H * W
    C = y_ref.shape[-1]
    n_tiles = PI // TILE
    inv_tile = 1.0 / TILE

    sc = sc_ref[...]
    sh = sh_ref[...]

    # Zero halo is re-written every grid step (scratch is uninitialized/reused).
    zeros_halo = jnp.zeros((PADR, C), pad_ref.dtype)
    pad_ref[0:PADR, :] = zeros_halo
    pad_ref[PADR + PI:PADR + PI + PADR, :] = zeros_halo

    # Pass 1: normalize + ReLU each row tile into the padded scratch.
    def fill_tile(t, carry):
        r = pl.multiple_of(t * TILE, 8)
        y = y_ref[0, pl.ds(r, TILE), :].astype(jnp.float32) * sc + sh
        pad_ref[pl.ds(PADR + r, TILE), :] = jnp.maximum(y, 0.0).astype(pad_ref.dtype)
        return carry

    lax.fori_loop(0, n_tiles, fill_tile, 0)

    # Column-validity masks: TILE is a multiple of W and every tile starts at a
    # multiple of W, so the mask pattern is tile-invariant (hoisted once).
    w_col = lax.broadcasted_iota(jnp.int32, (TILE, 1), 0) % W
    mask_l = w_col > 0          # tap dx = -1 would cross the left image edge
    mask_r = w_col < (W - 1)    # tap dx = +1 would cross the right image edge

    # Pass 2: 3x3 conv per row tile + per-tile centered BN partials.
    def conv_tile(t, carry):
        r = pl.multiple_of(t * TILE, 8)
        taps = []
        for dy in (-1, 0, 1):
            for dx in (-1, 0, 1):
                off = dy * W + dx
                tap = pad_ref[pl.ds(PADR + r + off, TILE), :]
                if dx == -1:
                    tap = jnp.where(mask_l, tap, jnp.zeros_like(tap))
                elif dx == 1:
                    tap = jnp.where(mask_r, tap, jnp.zeros_like(tap))
                taps.append(tap)
        if im2col:
            # One MXU matmul with K = 9*C (v6e's 256-deep MXU benefits).
            tap_mat = jnp.concatenate(taps, axis=-1)                   # (TILE, 9*C)
            o = jnp.dot(tap_mat, w_ref[...], preferred_element_type=jnp.float32)
        else:
            # v7x (MRB in-place accumulation) / v5e (128-wide MXU): nine
            # accumulated matmuls avoid the (TILE, 9*C) concat's vld/vst cost.
            o = None
            for k, tap in enumerate(taps):
                d = jnp.dot(tap, w_ref[k * C:(k + 1) * C, :],
                            preferred_element_type=jnp.float32)
                o = d if o is None else o + d
        o_ref[0, pl.ds(r, TILE), :] = o.astype(o_ref.dtype)
        s = jnp.sum(o, axis=0, keepdims=True)
        dev = o - s * inv_tile
        s_ref[0, pl.ds(t, 1), :] = s
        m2_ref[0, pl.ds(t, 1), :] = jnp.sum(dev * dev, axis=0, keepdims=True)
        return carry

    lax.fori_loop(0, n_tiles, conv_tile, 0)


def _bn_add_relu_kernel(y_ref, x_ref, sc_ref, sh_ref, o_ref):
    """Apply BN3 + residual add + ReLU on a row tile."""
    y = y_ref[...].astype(jnp.float32) * sc_ref[...] + sh_ref[...]
    o_ref[...] = jnp.maximum(y + x_ref[...].astype(jnp.float32), 0.0).astype(o_ref.dtype)


# ---------------------------------------------------------------------------
# Host-side glue
# ---------------------------------------------------------------------------

def _bn_scale_shift(s_part, m2_part, gamma, beta, rows_per_part):
    """Combine per-tile (sum, centered M2) partials -> BN scale/shift.

    Parallel-variance (Chan) combination; training-mode biased variance,
    matching PyTorch BatchNorm2d.forward.
    """
    C = s_part.shape[-1]
    s = s_part.reshape(-1, C).astype(jnp.float32)       # (T, C)
    m2 = m2_part.reshape(-1, C).astype(jnp.float32)     # (T, C)
    n = float(rows_per_part)
    count = n * s.shape[0]
    mean_i = s / n
    mean = jnp.sum(s, axis=0) / count
    m2_tot = jnp.sum(m2, axis=0) + n * jnp.sum(jnp.square(mean_i - mean), axis=0)
    var = jnp.maximum(m2_tot / count, 0.0)
    scale = gamma.astype(jnp.float32) * lax.rsqrt(var + EPS)
    shift = beta.astype(jnp.float32) - mean * scale
    return scale.reshape(1, -1), shift.reshape(1, -1)


def residual_block_nhwc(x, params, mm_dtype=jnp.bfloat16):
    """Bottleneck Residualblock forward (stride=1, id=None) on NHWC input."""
    w1, w2, w3, g1, b1, g2, b2, g3, b3 = params
    N, H, W, Cin = x.shape
    CH = w1.shape[0]
    Cout = w3.shape[0]
    assert Cout == Cin, "identity add requires input == hidden * ratio"
    PI = H * W
    R = N * PI
    f32 = jnp.float32

    vmem_limit, use_im2col = _chip_config()
    CHp = _pad128(CH)                  # lane-padded hidden width
    Cp = _pad128(Cin)                  # lane-padded input/output width

    # --- host-side weight / BN-parameter prep (tiny, lane-padded) ----------
    w1t = _pad_to(jnp.transpose(w1[:, :, 0, 0]), Cp, CHp).astype(mm_dtype)
    w9 = _pad_to(jnp.transpose(w2, (2, 3, 1, 0)).reshape(9, CH, CH), 9, CHp, CHp)
    w2cat = w9.reshape(9 * CHp, CHp).astype(mm_dtype)
    w3t = _pad_to(jnp.transpose(w3[:, :, 0, 0]), CHp, Cp).astype(mm_dtype)
    g1p, b1p = _pad_to(g1.astype(f32), CHp), _pad_to(b1.astype(f32), CHp)
    g2p, b2p = _pad_to(g2.astype(f32), CHp), _pad_to(b2.astype(f32), CHp)
    g3p, b3p = _pad_to(g3.astype(f32), Cp), _pad_to(b3.astype(f32), Cp)

    # Residual / stage-1 input stays in its native dtype (no f32 HBM copy);
    # lanes are zero-padded so every load/store is lane-dense.
    xf = _pad_to(x.reshape(R, Cin), R, Cp)

    TP = _pick_row_tile(R)             # row tile for the 1x1 / eltwise stages
    TR = R // TP
    T2 = _pick_conv_tile(H, W)         # in-kernel row tile for the 3x3 stage
    n2 = PI // T2
    PADR = -(-(W + 1) // 8) * 8        # zero-halo rows (>= W+1, 8-aligned)

    cparams = pltpu.CompilerParams(
        dimension_semantics=("parallel",),
        vmem_limit_bytes=vmem_limit)

    def row_spec(c):
        return pl.BlockSpec((TP, c), lambda i: (i, 0))

    def const_spec(shape):
        # Resident blocks (constant index_map).  On newer JAX these could be
        # single-buffered via pipeline_mode=pl.Buffered(1) to save VMEM.
        nd = len(shape)
        return pl.BlockSpec(shape, lambda i: (0,) * nd)

    def stat_spec(c):
        return pl.BlockSpec((1, 1, c), lambda i: (i, 0, 0))

    def stat_shape(c):
        return jax.ShapeDtypeStruct((TR, 1, c), f32)

    # -- stage 1: conv1 (1x1) + BN1 partial stats ---------------------------
    y1, s1, m21 = pl.pallas_call(
        functools.partial(_conv1x1_stats_kernel, mm_dtype=mm_dtype),
        grid=(TR,),
        in_specs=[row_spec(Cp), const_spec((Cp, CHp))],
        out_specs=[row_spec(CHp), stat_spec(CHp), stat_spec(CHp)],
        out_shape=[jax.ShapeDtypeStruct((R, CHp), mm_dtype),
                   stat_shape(CHp), stat_shape(CHp)],
        compiler_params=cparams,
    )(xf, w1t)
    sc1, sh1 = _bn_scale_shift(s1, m21, g1p, b1p, TP)

    # -- stage 2: BN1 + ReLU + conv2 (3x3) + BN2 partial stats --------------
    img_spec = pl.BlockSpec((1, PI, CHp), lambda n: (n, 0, 0))
    stat2_spec = pl.BlockSpec((1, n2, CHp), lambda n: (n, 0, 0))
    y2, s2, m22 = pl.pallas_call(
        functools.partial(_bn_conv3x3_stats_kernel, H=H, W=W, PADR=PADR,
                          TILE=T2, im2col=use_im2col),
        grid=(N,),
        in_specs=[img_spec, const_spec((1, CHp)), const_spec((1, CHp)),
                  const_spec((9 * CHp, CHp))],
        out_specs=[img_spec, stat2_spec, stat2_spec],
        out_shape=[jax.ShapeDtypeStruct((N, PI, CHp), mm_dtype),
                   jax.ShapeDtypeStruct((N, n2, CHp), f32),
                   jax.ShapeDtypeStruct((N, n2, CHp), f32)],
        scratch_shapes=[pltpu.VMEM((PI + 2 * PADR, CHp), mm_dtype)],
        compiler_params=cparams,
    )(y1.reshape(N, PI, CHp), sc1, sh1, w2cat)
    sc2, sh2 = _bn_scale_shift(s2, m22, g2p, b2p, T2)

    # -- stage 3: BN2 + ReLU + conv3 (1x1) + BN3 partial stats --------------
    y3, s3, m23 = pl.pallas_call(
        functools.partial(_bn_conv1x1_stats_kernel, mm_dtype=mm_dtype),
        grid=(TR,),
        in_specs=[row_spec(CHp), const_spec((1, CHp)), const_spec((1, CHp)),
                  const_spec((CHp, Cp))],
        out_specs=[row_spec(Cp), stat_spec(Cp), stat_spec(Cp)],
        out_shape=[jax.ShapeDtypeStruct((R, Cp), mm_dtype),
                   stat_shape(Cp), stat_shape(Cp)],
        compiler_params=cparams,
    )(y2.reshape(R, CHp), sc2, sh2, w3t)
    sc3, sh3 = _bn_scale_shift(s3, m23, g3p, b3p, TP)

    # -- stage 4: BN3 + residual add + ReLU ---------------------------------
    out = pl.pallas_call(
        _bn_add_relu_kernel,
        grid=(TR,),
        in_specs=[row_spec(Cp), row_spec(Cp), const_spec((1, Cp)),
                  const_spec((1, Cp))],
        out_specs=row_spec(Cp),
        out_shape=jax.ShapeDtypeStruct((R, Cp), x.dtype),
        compiler_params=cparams,
    )(y3, xf, sc3, sh3)

    return out[:, :Cout].reshape(N, H, W, Cout)


def residual_block(x_nchw, params, mm_dtype=jnp.bfloat16):
    # TODO(synk): only the stride=1 / id=None branch of Residualblock is
    # implemented (the optional `id` downsample is an arbitrary nn.Module and
    # is not translated).  The NCHW<->NHWC transposes below are plain XLA ops
    # outside the kernels; prefer residual_block_nhwc() to avoid those two
    # extra HBM round trips.
    x = jnp.transpose(x_nchw, (0, 2, 3, 1))
    out = residual_block_nhwc(x, params, mm_dtype=mm_dtype)
    return jnp.transpose(out, (0, 3, 1, 2))


# ---------------------------------------------------------------------------
# Reference + self-test
# ---------------------------------------------------------------------------

def reference(x, params):
    """Pure-JAX (XLA) reference in NCHW, PyTorch training-mode BN semantics."""
    w1, w2, w3, g1, b1, g2, b2, g3, b3 = params
    dn = ('NCHW', 'OIHW', 'NCHW')

    def bn(y, g, b):
        mean = jnp.mean(y, axis=(0, 2, 3), keepdims=True)
        var = jnp.mean(jnp.square(y - mean), axis=(0, 2, 3), keepdims=True)
        return ((y - mean) * lax.rsqrt(var + EPS) * g.reshape(1, -1, 1, 1)
                + b.reshape(1, -1, 1, 1))

    y = lax.conv_general_dilated(x, w1, (1, 1), 'VALID', dimension_numbers=dn)
    y = jnp.maximum(bn(y, g1, b1), 0.0)
    y = lax.conv_general_dilated(y, w2, (1, 1), ((1, 1), (1, 1)),
                                 dimension_numbers=dn)
    y = jnp.maximum(bn(y, g2, b2), 0.0)
    y = lax.conv_general_dilated(y, w3, (1, 1), 'VALID', dimension_numbers=dn)
    y = bn(y, g3, b3)
    return jnp.maximum(y + x, 0.0)


def _make_params(key, cin, hidden, ratio):
    ks = jax.random.split(key, 9)
    w1 = jax.random.normal(ks[0], (hidden, cin, 1, 1), jnp.float32) * 0.1
    w2 = jax.random.normal(ks[1], (hidden, hidden, 3, 3), jnp.float32) * 0.1
    w3 = jax.random.normal(ks[2], (hidden * ratio, hidden, 1, 1), jnp.float32) * 0.1
    g1 = 1.0 + 0.1 * jax.random.normal(ks[3], (hidden,), jnp.float32)
    b1 = 0.1 * jax.random.normal(ks[4], (hidden,), jnp.float32)
    g2 = 1.0 + 0.1 * jax.random.normal(ks[5], (hidden,), jnp.float32)
    b2 = 0.1 * jax.random.normal(ks[6], (hidden,), jnp.float32)
    g3 = 1.0 + 0.1 * jax.random.normal(ks[7], (hidden * ratio,), jnp.float32)
    b3 = 0.1 * jax.random.normal(ks[8], (hidden * ratio,), jnp.float32)
    return (w1, w2, w3, g1, b1, g2, b2, g3, b3)


if __name__ == "__main__":
    key = jax.random.PRNGKey(0)
    k_a, k_b = jax.random.split(key)

    # Config A: small channels (exercises lane padding of hidden=8 -> 128 and
    # cin=32 -> 128) with f32 MXU inputs -> tight check vs the XLA reference.
    N, H, W, hidden, ratio = 2, 8, 8, 8, 4
    cin = hidden * ratio
    kx, kp = jax.random.split(k_a)
    x_a = jax.random.normal(kx, (N, cin, H, W), jnp.float32)
    p_a = _make_params(kp, cin, hidden, ratio)
    out_a = jax.block_until_ready(residual_block(x_a, p_a, mm_dtype=jnp.float32))
    ref_a = jax.block_until_ready(reference(x_a, p_a))
    assert out_a.shape == (N, cin, H, W), out_a.shape
    err_a = float(jnp.max(jnp.abs(out_a - ref_a)))
    assert err_a < 5e-3, f"f32 config mismatch vs reference: max_err={err_a}"

    # Config B: lane-aligned channels (hidden=128, cin=512; exercises the
    # generation-selected im2col / accumulate conv2 paths) with bf16 MXU inputs.
    hidden_b = 128
    cin_b = hidden_b * ratio
    kx2, kp2 = jax.random.split(k_b)
    x_b = jax.random.normal(kx2, (N, cin_b, H, W), jnp.float32)
    p_b = _make_params(kp2, cin_b, hidden_b, ratio)
    out_b = jax.block_until_ready(residual_block(x_b, p_b, mm_dtype=jnp.bfloat16))
    ref_b = jax.block_until_ready(reference(x_b, p_b))
    assert out_b.shape == (N, cin_b, H, W), out_b.shape
    rel_b = float(jnp.sqrt(jnp.sum(jnp.square(out_b - ref_b)))
                  / jnp.sqrt(jnp.sum(jnp.square(ref_b))))
    assert rel_b < 0.15, f"bf16 config mismatch vs reference: rel_err={rel_b}"

    print("KERNEL_OK")
</pallas_src>

<mosaic_0001>
module attributes {stable_mosaic.version = 11 : i64} {
  func.func @_conv1x1_stats_kernel(%arg0: i32, %arg1: memref<128x128xf32, #tpu.memory_space<vmem>>, %arg2: memref<128x128xf32, #tpu.memory_space<vmem>>, %arg3: memref<128x128xf32, #tpu.memory_space<vmem>>, %arg4: memref<1x1x128xf32, #tpu.memory_space<vmem>>, %arg5: memref<1x1x128xf32, #tpu.memory_space<vmem>>) attributes {dimension_semantics = [#tpu.dimension_semantics<parallel>], iteration_bounds = array<i64: 1>, scalar_prefetch = 0 : i64, scratch_operands = 0 : i64, tpu.core_type = #tpu.core_type<tc>, window_params = [{transform_indices = @transform_0, window_bounds = array<i64: 128, 128>}, {pipeline_mode = #tpu.pipeline_mode<synchronous>, transform_indices = @transform_1, window_bounds = array<i64: 128, 128>}, {transform_indices = @transform_2, window_bounds = array<i64: 128, 128>}, {transform_indices = @transform_3, window_bounds = array<i64: 1, 1, 128>}, {transform_indices = @transform_4, window_bounds = array<i64: 1, 1, 128>}]} {
    %c0 = arith.constant 0 : index
    %c0_0 = arith.constant 0 : index
    %0 = vector.load %arg1[%c0, %c0_0] : memref<128x128xf32, #tpu.memory_space<vmem>>, vector<128x128xf32>
    %c0_1 = arith.constant 0 : index
    %c0_2 = arith.constant 0 : index
    %1 = vector.load %arg2[%c0_1, %c0_2] : memref<128x128xf32, #tpu.memory_space<vmem>>, vector<128x128xf32>
    %cst = arith.constant dense<0.000000e+00> : vector<128x128xf32>
    %2 = tpu.matmul %0, %1, %cst {dimension_numbers = #tpu.dot_dimension_numbers<[1], [0], [0], [1], [0, 0, 1, 1], [], []>} : vector<128x128xf32>, vector<128x128xf32>, vector<128x128xf32> -> vector<128x128xf32>
    %c0_3 = arith.constant 0 : index
    %c0_4 = arith.constant 0 : index
    %3 = vector.load %arg3[%c0_3, %c0_4] : memref<128x128xf32, #tpu.memory_space<vmem>>, vector<128x128xf32>
    tpu.vector_store %arg3[%c0_3, %c0_4], %2 {strides = array<i32>} : memref<128x128xf32, #tpu.memory_space<vmem>>, vector<128x128xf32>,
    %cst_5 = arith.constant dense<0.000000e+00> : vector<128xf32>
    %4 = vector.multi_reduction <add>, %2, %cst_5 [0] : vector<128x128xf32> to vector<128xf32>
    %5 = vector.shape_cast %4 : vector<128xf32> to vector<1x128xf32>
    %cst_6 = arith.constant 7.812500e-03 : f32
    %6 = vector.broadcast %cst_6 : f32 to vector<1x128xf32>
    %7 = arith.mulf %5, %6 : vector<1x128xf32>
    %8 = vector.broadcast %7 : vector<1x128xf32> to vector<128x128xf32>
    %9 = arith.subf %2, %8 : vector<128x128xf32>
    %c0_7 = arith.constant 0 : index
    %c0_8 = arith.constant 0 : index
    %c0_9 = arith.constant 0 : index
    %10 = vector.load %arg4[%c0_7, %c0_8, %c0_9] : memref<1x1x128xf32, #tpu.memory_space<vmem>>, vector<1x1x128xf32>
    %11 = vector.shape_cast %10 : vector<1x1x128xf32> to vector<1x128xf32>
    %12 = vector.shape_cast %5 : vector<1x128xf32> to vector<1x1x128xf32>
    tpu.vector_store %arg4[%c0_7, %c0_8, %c0_9], %12 {strides = array<i32>} : memref<1x1x128xf32, #tpu.memory_space<vmem>>, vector<1x1x128xf32>,
    %13 = arith.mulf %9, %9 : vector<128x128xf32>
    %cst_10 = arith.constant dense<0.000000e+00> : vector<128xf32>
    %14 = vector.multi_reduction <add>, %13, %cst_10 [0] : vector<128x128xf32> to vector<128xf32>
    %15 = vector.shape_cast %14 : vector<128xf32> to vector<1x128xf32>
    %c0_11 = arith.constant 0 : index
    %c0_12 = arith.constant 0 : index
    %c0_13 = arith.constant 0 : index
    %16 = vector.load %arg5[%c0_11, %c0_12, %c0_13] : memref<1x1x128xf32, #tpu.memory_space<vmem>>, vector<1x1x128xf32>
    %17 = vector.shape_cast %16 : vector<1x1x128xf32> to vector<1x128xf32>
    %18 = vector.shape_cast %15 : vector<1x128xf32> to vector<1x1x128xf32>
    tpu.vector_store %arg5[%c0_11, %c0_12, %c0_13], %18 {strides = array<i32>} : memref<1x1x128xf32, #tpu.memory_space<vmem>>, vector<1x1x128xf32>,
    return
  }
  func.func @transform_0(%arg0: i32) -> (i32, i32) {
    %c0_i32 = arith.constant 0 : i32
    %c0_i32_0 = arith.constant 0 : i32
    return %arg0, %c0_i32 : i32, i32
  }
  func.func @transform_1(%arg0: i32) -> (i32, i32) {
    %c0_i32 = arith.constant 0 : i32
    %c0_i32_0 = arith.constant 0 : i32
    %c0_i32_1 = arith.constant 0 : i32
    return %c0_i32, %c0_i32_0 : i32, i32
  }
  func.func @transform_2(%arg0: i32) -> (i32, i32) {
    %c0_i32 = arith.constant 0 : i32
    %c0_i32_0 = arith.constant 0 : i32
    return %arg0, %c0_i32 : i32, i32
  }
  func.func @transform_3(%arg0: i32) -> (i32, i32, i32) {
    %c0_i32 = arith.constant 0 : i32
    %c0_i32_0 = arith.constant 0 : i32
    %c0_i32_1 = arith.constant 0 : i32
    return %arg0, %c0_i32, %c0_i32_0 : i32, i32, i32
  }
  func.func @transform_4(%arg0: i32) -> (i32, i32, i32) {
    %c0_i32 = arith.constant 0 : i32
    %c0_i32_0 = arith.constant 0 : i32
    %c0_i32_1 = arith.constant 0 : i32
    return %arg0, %c0_i32, %c0_i32_0 : i32, i32, i32
  }
}

</mosaic_0001>

<bundles_post_ra>
// kernel: tpu_custom_call.1
= control target key start
LH: loop header
LB: loop body
LE: loop exit
PB: predicated region body
PF: predicated region fallthrough
CT: control target
= control target key end

     0   :  { %10 = vsyncpa [#allocation3], 0  ;;  %s796_s0 = inlined_call_operand.hbm [shape: f32[128,128], index: 0, kind: input, shape index: {}]   ;;  %s797_s1 = inlined_call_operand.hbm [shape: f32[128,128], index: 1, kind: input, shape index: {}]   ;;  %s798_s2 = inlined_call_operand.hbm [shape: f32[128,128], index: 2, kind: output, shape index: {0}]   ;;  %s799_s3 = inlined_call_operand.hbm [shape: f32[1,1,128], index: 3, kind: output, shape index: {1}]   ;;  %s800_s4 = inlined_call_operand.hbm [shape: f32[1,1,128], index: 4, kind: output, shape index: {2}]  }
   0x1   :  { %11 = vsyncpa [#allocation6], 0 }
   0x2   :  { %12 = vsyncpa [#allocation4], 0 }
   0x3   :  { %13 = vsyncpa [#allocation9], 0  ;;  %s620_s15 = smov [#allocation2]   ;;  %s502_s19 = scalar_lea.hbm %s796_s0, 2048 }
   0x4   :  { %s19_s16 = sshll.u32 %s620_s15, 4  ;;  %p503_p0 = scmp.ne.s32.totalorder %s796_s0, %s502_s19  ;;  %s20_s16 = int_to_ptr.vmem [resolvable:$true] %s19_s16 }
   0x5   :  { %p506_p1 = scmp.lt.u32.totalorder %s502_s19, %s796_s0 }
   0x7   :  { %p508_p2 = pnand %p506_p1, %p503_p0 }
   0x9   :  { %511 = shalt.err (!%p508_p2)
}
   0xa   :  { %s512_s24 = scalar_lea.vmem %s20_s16, 2048  ;;  %p517_p4 = scmp.lt.s32.totalorder %s20_s16, %s20_s16 }
   0xb   :  { %p513_p3 = scmp.ne.s32.totalorder %s20_s16, %s512_s24  ;;  %p518_p5 = scmp.lt.s32.totalorder %s512_s24, %s512_s24 }
   0xd   :  { %p519_p6 = por %p518_p5, %p517_p4 }
   0xf   :  { %p520_p7 = pnand %p519_p6, %p513_p3 }
  0x11   :  { %523 = shalt.err (!%p520_p7)
}
  0x12   :  { %s621_s25 = smov 128   ;;  %s622_s26 = smov 8  }
  0x13   :  { %25 = dma.hbm_to_vmem [thread:$0]  %s796_s0, 2048, %s20_s16, [#allocation3], %s621_s25, %s621_s25, %s622_s26  }
  0x14   :  { %s623_s29 = smov [#allocation5]   ;;  %s524_s7 = scalar_lea.hbm %s797_s1, 2048 }
  0x15   :  { %s31_s30 = sshll.u32 %s623_s29, 4  ;;  %p525_p8 = scmp.ne.s32.totalorder %s797_s1, %s524_s7  ;;  %s32_s30 = int_to_ptr.vmem [resolvable:$true] %s31_s30 }
  0x16   :  { %p528_p9 = scmp.lt.u32.totalorder %s524_s7, %s797_s1 }
  0x18   :  { %p530_p10 = pnand %p528_p9, %p525_p8 }
  0x1a   :  { %533 = shalt.err (!%p530_p10)
}
  0x1b   :  { %s534_s12 = scalar_lea.vmem %s32_s30, 2048  ;;  %p539_p12 = scmp.lt.s32.totalorder %s32_s30, %s32_s30 }
  0x1c   :  { %p535_p11 = scmp.ne.s32.totalorder %s32_s30, %s534_s12  ;;  %p540_p13 = scmp.lt.s32.totalorder %s534_s12, %s534_s12 }
  0x1e   :  { %p541_p0 = por %p540_p13, %p539_p12 }
  0x20   :  { %p542_p1 = pnand %p541_p0, %p535_p11 }
  0x22   :  { %545 = shalt.err (!%p542_p1)
}
  0x23   :  { %37 = dma.hbm_to_vmem [thread:$0]  %s797_s1, 2048, %s32_s30, [#allocation6], %s621_s25, %s621_s25, %s622_s26  }
  0x24   :  { %612 = dma.done.wait [#allocation3], 2048  }
  0x25   :  { %613 = vsyncadd [#allocation3], 4294965248 }
  0x26   :  { %614 = dma.done.wait [#allocation6], 2048  }
  0x27   :  { %615 = vsyncadd [#allocation6], 4294965248  ;;  %v60_v0 = vld [vmem:[#allocation5] sm:$0xff]  ;;  %v61_v1 = vld [vmem:[#allocation5 + $0x8] sm:$0xff]  ;;  %s624_s1 = smov [#allocation7]  }
  0x28   :  { %v62_v2 = vld [vmem:[#allocation5 + $0x10] sm:$0xff]  ;;  %v447_v3 = vpack.c.bf16 %v61_v1, %v60_v0  ;;  %v63_v4 = vld [vmem:[#allocation5 + $0x18] sm:$0xff]  ;;  %v64_v6 = vld [vmem:[#allocation5 + $0x20] sm:$0xff]  ;;  %s319_s14 = sshll.u32 %s624_s1, 4  ;;  %s320_s14 = int_to_ptr.vmem [resolvable:$true] %s319_s14 }
  0x29   :  { %v451_v5 = vpack.c.bf16 %v63_v4, %v62_v2  ;;  %v65_v7 = vld [vmem:[#allocation5 + $0x28] sm:$0xff]  ;;  %v44_v9 = vld [vmem:[#allocation2] sm:$0xff]  ;;  %v66_v10 = vld [vmem:[#allocation5 + $0x30] sm:$0xff]  ;;  %s546_s15 = scalar_lea.vmem %s320_s14, 2048  ;;  %p551_p3 = scmp.lt.s32.totalorder %s320_s14, %s320_s14 }
  0x2a   :  { %448 = vmatprep.subr.bf16.mxu0 %v447_v3  ;;  %479 = vmatprep.subr.bf16.mxu1 %v447_v3  ;;  %v455_v8 = vpack.c.bf16 %v65_v7, %v64_v6  ;;  %v67_v11 = vld [vmem:[#allocation5 + $0x38] sm:$0xff]  ;;  %v52_v12 = vld [vmem:[#allocation2 + $0x40] sm:$0xff]  ;;  %v69_v15 = vld [vmem:[#allocation5 + $0x48] sm:$0xff]  ;;  %p547_p2 = scmp.ne.s32.totalorder %s320_s14, %s546_s15  ;;  %p552_p4 = scmp.lt.s32.totalorder %s546_s15, %s546_s15 }
  0x2b   :  { %450 = vmatpush3.bf16.msra.mxu0 %v447_v3  ;;  %487 = vmatpush3.bf16.msra.mxu1 %v447_v3  ;;  %v459_v13 = vpack.c.bf16 %v67_v11, %v66_v10  ;;  %v68_v14 = vld [vmem:[#allocation5 + $0x40] sm:$0xff]  ;;  %v70_v17 = vld [vmem:[#allocation5 + $0x50] sm:$0xff]  ;;  %v71_v18 = vld [vmem:[#allocation5 + $0x58] sm:$0xff] }
  0x2c   :  { %452 = vmatprep.subr.bf16.mxu0 %v451_v5  ;;  %480 = vmatprep.subr.bf16.mxu1 %v451_v5  ;;  %v463_v16 = vpack.c.bf16 %v69_v15, %v68_v14  ;;  %v467_v19 = vpack.c.bf16 %v71_v18, %v70_v17  ;;  %v72_v20 = vld [vmem:[#allocation5 + $0x60] sm:$0xff]  ;;  %v73_v21 = vld [vmem:[#allocation5 + $0x68] sm:$0xff]  ;;  %v74_v23 = vld [vmem:[#allocation5 + $0x70] sm:$0xff]  ;;  %p553_p5 = por %p552_p4, %p551_p3 }
  0x2d   :  { %423 = vmatprep.mubr.f32.mxu0 %v44_v9  ;;  %435 = vmatprep.mubr.f32.mxu1 %v52_v12  ;;  %v471_v22 = vpack.c.bf16 %v73_v21, %v72_v20  ;;  %v75_v24 = vld [vmem:[#allocation5 + $0x78] sm:$0xff]  ;;  %v45_v26 = vld [vmem:[#allocation2 + $0x8] sm:$0xff]  ;;  %v46_v28 = vld [vmem:[#allocation2 + $0x10] sm:$0xff] }
  0x2e   :  { %v475_v25 = vpack.c.bf16 %v75_v24, %v74_v23  ;;  %v53_v27 = vld [vmem:[#allocation2 + $0x48] sm:$0xff]  ;;  %v54_v29 = vld [vmem:[#allocation2 + $0x50] sm:$0xff]  ;;  %v47_v30 = vld [vmem:[#allocation2 + $0x18] sm:$0xff]  ;;  %p554_p6 = pnand %p553_p5, %p547_p2 }
  0x2f   :  { %454 = vmatpush3.bf16.msra.mxu0 %v451_v5  ;;  %488 = vmatpush3.bf16.msra.mxu1 %v451_v5  ;;  %v55_v31 = vld [vmem:[#allocation2 + $0x58] sm:$0xff]  ;;  %v48_v32 = vld [vmem:[#allocation2 + $0x20] sm:$0xff]  ;;  %v49_v34 = vld [vmem:[#allocation2 + $0x28] sm:$0xff] }
  0x30   :  { %456 = vmatprep.subr.bf16.mxu0 %v455_v8  ;;  %481 = vmatprep.subr.bf16.mxu1 %v455_v8  ;;  %v56_v33 = vld [vmem:[#allocation2 + $0x60] sm:$0xff]  ;;  %v57_v35 = vld [vmem:[#allocation2 + $0x68] sm:$0xff]  ;;  %v50_v36 = vld [vmem:[#allocation2 + $0x30] sm:$0xff] }
  0x31   :  { %v58_v37 = vld [vmem:[#allocation2 + $0x70] sm:$0xff]  ;;  %v51_v38 = vld [vmem:[#allocation2 + $0x38] sm:$0xff] }
  0x32   :  { %v59_v39 = vld [vmem:[#allocation2 + $0x78] sm:$0xff] }
  0x33   :  { %458 = vmatpush3.bf16.msra.mxu0 %v455_v8  ;;  %489 = vmatpush3.bf16.msra.mxu1 %v455_v8 }
  0x34   :  { %460 = vmatprep.subr.bf16.mxu0 %v459_v13  ;;  %482 = vmatprep.subr.bf16.mxu1 %v459_v13 }
  0x37   :  { %462 = vmatpush3.bf16.msra.mxu0 %v459_v13  ;;  %490 = vmatpush3.bf16.msra.mxu1 %v459_v13 }
  0x38   :  { %464 = vmatprep.subr.bf16.mxu0 %v463_v16  ;;  %483 = vmatprep.subr.bf16.mxu1 %v463_v16 }
  0x3b   :  { %466 = vmatpush3.bf16.msra.mxu0 %v463_v16  ;;  %491 = vmatpush3.bf16.msra.mxu1 %v463_v16 }
  0x3c   :  { %468 = vmatprep.subr.bf16.mxu0 %v467_v19  ;;  %484 = vmatprep.subr.bf16.mxu1 %v467_v19 }
  0x3f   :  { %470 = vmatpush3.bf16.msra.mxu0 %v467_v19  ;;  %492 = vmatpush3.bf16.msra.mxu1 %v467_v19 }
  0x40   :  { %472 = vmatprep.subr.bf16.mxu0 %v471_v22  ;;  %485 = vmatprep.subr.bf16.mxu1 %v471_v22 }
  0x43   :  { %474 = vmatpush3.bf16.msra.mxu0 %v471_v22  ;;  %493 = vmatpush3.bf16.msra.mxu1 %v471_v22 }
  0x44   :  { %476 = vmatprep.subr.bf16.mxu0 %v475_v25  ;;  %486 = vmatprep.subr.bf16.mxu1 %v475_v25 }
  0x47   :  { %478 = vmatpush3.bf16.msra.mxu0 %v475_v25  ;;  %494 = vmatpush3.bf16.msra.mxu1 %v475_v25 }
  0x4a   :  { %424 = vmatmul.mubr.f32.vlgmr.msra.gmra.mrb[0].mxu0 %v45_v26  ;;  %436 = vmatmul.mubr.f32.vlgmr.msra.gmra.mrb[0].mxu1 %v53_v27 }
  0x4b   :  { %426 = vmatprep.mubr.f32.mxu0 %v46_v28  ;;  %438 = vmatprep.mubr.f32.mxu1 %v54_v29 }
  0x4e   :  { %427 = vmatmul.mubr.f32.gmra.mrb[2].mxu0 %v47_v30  ;;  %439 = vmatmul.mubr.f32.gmra.mrb[2].mxu1 %v55_v31 }
  0x4f   :  { %429 = vmatprep.mubr.f32.mxu0 %v48_v32  ;;  %441 = vmatprep.mubr.f32.mxu1 %v56_v33 }
  0x52   :  { %430 = vmatmul.mubr.f32.gmra.mrb[4].mxu0 %v49_v34  ;;  %442 = vmatmul.mubr.f32.gmra.mrb[4].mxu1 %v57_v35 }
  0x53   :  { %432 = vmatprep.mubr.f32.mxu0 %v50_v36  ;;  %444 = vmatprep.mubr.f32.mxu1 %v58_v37 }
  0x56   :  { %433 = vmatmul.mubr.f32.gmra.mrb[6].mxu0 %v51_v38  ;;  %445 = vmatmul.mubr.f32.gmra.mrb[6].mxu1 %v59_v39 }
 0x11d   :  { %v682_v40 = vpop.f32.mrb[0].mxu0  ;;  %v684_v41 = vpop.f32.mrb[0].mxu1 }
 0x11e   :  { %222 = vst [vmem:[#allocation7 + $0x8] sm:$0xff] %v682_v40  ;;  %v687_v42 = vpop.f32.mrb[1].mxu0  ;;  %230 = vst [vmem:[#allocation7 + $0x48] sm:$0xff] %v684_v41  ;;  %v690_v43 = vpop.f32.mrb[1].mxu1 }
 0x11f   :  { %221 = vst [vmem:[#allocation7] sm:$0xff] %v687_v42  ;;  %v237_v44 = vadd.f32 %v682_v40, %v687_v42  ;;  %229 = vst [vmem:[#allocation7 + $0x40] sm:$0xff] %v690_v43 }
 0x121   :  { %v696_v45 = vpop.f32.mrb[2].mxu0  ;;  %v698_v46 = vpop.f32.mrb[2].mxu1 }
 0x122   :  { %224 = vst [vmem:[#allocation7 + $0x18] sm:$0xff] %v696_v45  ;;  %v701_v47 = vpop.f32.mrb[3].mxu0  ;;  %232 = vst [vmem:[#allocation7 + $0x58] sm:$0xff] %v698_v46  ;;  %v704_v48 = vpop.f32.mrb[3].mxu1 }
 0x123   :  { %223 = vst [vmem:[#allocation7 + $0x10] sm:$0xff] %v701_v47  ;;  %v238_v49 = vadd.f32 %v237_v44, %v701_v47  ;;  %231 = vst [vmem:[#allocation7 + $0x50] sm:$0xff] %v704_v48 }
 0x125   :  { %v709_v50 = vpop.f32.mrb[4].mxu0  ;;  %v239_v51 = vadd.f32 %v696_v45, %v238_v49  ;;  %v712_v52 = vpop.f32.mrb[4].mxu1 }
 0x126   :  { %226 = vst [vmem:[#allocation7 + $0x28] sm:$0xff] %v709_v50  ;;  %v715_v53 = vpop.f32.mrb[5].mxu0  ;;  %234 = vst [vmem:[#allocation7 + $0x68] sm:$0xff] %v712_v52  ;;  %v718_v54 = vpop.f32.mrb[5].mxu1 }
 0x127   :  { %225 = vst [vmem:[#allocation7 + $0x20] sm:$0xff] %v715_v53  ;;  %v240_v55 = vadd.f32 %v239_v51, %v715_v53  ;;  %233 = vst [vmem:[#allocation7 + $0x60] sm:$0xff] %v718_v54 }
 0x129   :  { %v723_v56 = vpop.f32.mrb[6].mxu0  ;;  %v241_v57 = vadd.f32 %v709_v50, %v240_v55  ;;  %v726_v58 = vpop.f32.mrb[6].mxu1 }
 0x12a   :  { %228 = vst [vmem:[#allocation7 + $0x38] sm:$0xff] %v723_v56  ;;  %v172_v59 = vpop.f32.mrb[7].mxu0  ;;  %236 = vst [vmem:[#allocation7 + $0x78] sm:$0xff] %v726_v58  ;;  %v730_v60 = vpop.f32.mrb[7].mxu1 }
 0x12b   :  { %227 = vst [vmem:[#allocation7 + $0x30] sm:$0xff] %v172_v59  ;;  %v242_v61 = vadd.f32 %v241_v57, %v172_v59  ;;  %235 = vst [vmem:[#allocation7 + $0x70] sm:$0xff] %v730_v60 }
 0x12c   :  { %557 = shalt.err (!%p554_p6)
}
 0x12d   :  { %s558_s18 = scalar_lea.hbm %s798_s2, 2048 }
 0x12e   :  { %p559_p7 = scmp.ne.s32.totalorder %s798_s2, %s558_s18  ;;  %p562_p8 = scmp.lt.u32.totalorder %s558_s18, %s798_s2 }
 0x130   :  { %p564_p9 = pnand %p562_p8, %p559_p7 }
 0x132   :  { %567 = shalt.err (!%p564_p9)
}
 0x133   :  { %325 = dma.vmem_to_hbm [thread:$0]  %s320_s14, 2048, %s798_s2, [#allocation4], %s621_s25, %s621_s25, %s622_s26   ;;  %v243_v62 = vadd.f32 %v723_v56, %v242_v61 }
 0x134   :  { %s625_s2 = smov [#allocation8]  }
 0x135   :  { %v244_v63 = vadd.f32 %v243_v62, %v690_v43  ;;  %s332_s25 = sshll.u32 %s625_s2, 4  ;;  %s333_s25 = int_to_ptr.vmem [resolvable:$true] %s332_s25 }
 0x136   :  { %s568_s26 = scalar_lea.vmem %s333_s25, 16  ;;  %s572_s27 = scalar_lea.vmem %s333_s25, 32 }
 0x137   :  { %v245_v0 = vadd.f32 %v684_v41, %v244_v63  ;;  %p569_p10 = scmp.ne.s32.totalorder %s333_s25, %s568_s26  ;;  %p573_p11 = scmp.lt.s32.totalorder %s333_s25, %s333_s25 }
 0x138   :  { %p574_p12 = scmp.lt.s32.totalorder %s572_s27, %s568_s26 }
 0x139   :  { %v246_v1 = vadd.f32 %v245_v0, %v704_v48 }
 0x13a   :  { %p575_p13 = por %p574_p12, %p573_p11 }
 0x13b   :  { %v247_v2 = vadd.f32 %v698_v46, %v246_v1 }
 0x13c   :  { %p576_p0 = pnand %p575_p13, %p569_p10 }
 0x13d   :  { %v248_v3 = vadd.f32 %v247_v2, %v718_v54 }
 0x13f   :  { %v249_v4 = vadd.f32 %v712_v52, %v248_v3 }
 0x141   :  { %v250_v5 = vadd.f32 %v249_v4, %v730_v60 }
 0x143   :  { %v251_v6 = vadd.f32 %v726_v58, %v250_v5 }
 0x145   :  { %v252_v7 = vrot.slane %v251_v6, 4 }
 0x147   :  { %v253_v8 = vadd.f32 %v252_v7, %v251_v6 }
 0x149   :  { %v254_v9 = vrot.slane %v253_v8, 2 }
 0x14b   :  { %v255_v10 = vadd.f32 %v254_v9, %v253_v8 }
 0x14d   :  { %v256_v11 = vrot.slane %v255_v10, 1 }
 0x14f   :  { %v257_v12 = vadd.f32 %v256_v11, %v255_v10 }
 0x151   :  { %v258_v13 = vmul.f32 0.0078125, %v257_v12  ;;  %275 = vst [vmem:[#allocation8] sm:$0x1] %v257_v12 }
 0x152   :  { %579 = shalt.err (!%p576_p0)
}
 0x153   :  { %s580_s30 = scalar_lea.hbm %s799_s3, 16 }
 0x154   :  { %p581_p1 = scmp.ne.s32.totalorder %s799_s3, %s580_s30  ;;  %p584_p2 = scmp.lt.u32.totalorder %s580_s30, %s799_s3 }
 0x156   :  { %p586_p3 = pnand %p584_p2, %p581_p1 }
 0x158   :  { %589 = shalt.err (!%p586_p3)
}
 0x159   :  { %335 = dma.vmem_to_hbm [thread:$0]  %s333_s25, 16, %s799_s3, [#allocation9]   ;;  %v259_v14 = vsub.f32 %v687_v42, %v258_v13  ;;  %v260_v15 = vsub.f32 %v682_v40, %v258_v13  ;;  %v261_v16 = vsub.f32 %v701_v47, %v258_v13  ;;  %v262_v17 = vsub.f32 %v696_v45, %v258_v13 }
 0x15a   :  { %v263_v18 = vsub.f32 %v715_v53, %v258_v13  ;;  %v264_v19 = vsub.f32 %v709_v50, %v258_v13  ;;  %v265_v20 = vsub.f32 %v172_v59, %v258_v13  ;;  %v266_v21 = vsub.f32 %v723_v56, %v258_v13  ;;  %s626_s3 = smov [#allocation10]  }
 0x15b   :  { %v267_v22 = vsub.f32 %v690_v43, %v258_v13  ;;  %v268_v23 = vsub.f32 %v684_v41, %v258_v13  ;;  %v269_v24 = vsub.f32 %v704_v48, %v258_v13  ;;  %v270_v25 = vsub.f32 %v698_v46, %v258_v13  ;;  %s342_s11 = sshll.u32 %s626_s3, 4  ;;  %s343_s11 = int_to_ptr.vmem [resolvable:$true] %s342_s11 }
 0x15c   :  { %v271_v26 = vsub.f32 %v718_v54, %v258_v13  ;;  %v272_v27 = vsub.f32 %v712_v52, %v258_v13  ;;  %v273_v28 = vsub.f32 %v730_v60, %v258_v13  ;;  %v274_v29 = vsub.f32 %v726_v58, %v258_v13  ;;  %s590_s12 = scalar_lea.vmem %s343_s11, 16  ;;  %s594_s0 = scalar_lea.vmem %s343_s11, 32 }
 0x15d   :  { %v276_v30 = vmul.f32 %v259_v14, %v259_v14  ;;  %v277_v31 = vmul.f32 %v260_v15, %v260_v15  ;;  %v278_v32 = vmul.f32 %v261_v16, %v261_v16  ;;  %v279_v34 = vmul.f32 %v262_v17, %v262_v17  ;;  %p591_p4 = scmp.ne.s32.totalorder %s343_s11, %s590_s12  ;;  %p595_p5 = scmp.lt.s32.totalorder %s343_s11, %s343_s11 }
 0x15e   :  { %v280_v36 = vmul.f32 %v263_v18, %v263_v18  ;;  %v281_v38 = vmul.f32 %v264_v19, %v264_v19  ;;  %v282_v40 = vmul.f32 %v265_v20, %v265_v20  ;;  %v283_v42 = vmul.f32 %v266_v21, %v266_v21  ;;  %p596_p6 = scmp.lt.s32.totalorder %s594_s0, %s590_s12 }
 0x15f   :  { %v292_v33 = vadd.f32 %v277_v31, %v276_v30  ;;  %v284_v44 = vmul.f32 %v267_v22, %v267_v22  ;;  %v285_v46 = vmul.f32 %v268_v23, %v268_v23  ;;  %v286_v48 = vmul.f32 %v269_v24, %v269_v24 }
 0x160   :  { %v287_v50 = vmul.f32 %v270_v25, %v270_v25  ;;  %v288_v52 = vmul.f32 %v271_v26, %v271_v26  ;;  %v289_v54 = vmul.f32 %v272_v27, %v272_v27  ;;  %v290_v56 = vmul.f32 %v273_v28, %v273_v28  ;;  %p597_p7 = por %p596_p6, %p595_p5 }
 0x161   :  { %v293_v35 = vadd.f32 %v292_v33, %v278_v32  ;;  %v291_v58 = vmul.f32 %v274_v29, %v274_v29 }
 0x162   :  { %p598_p8 = pnand %p597_p7, %p591_p4 }
 0x163   :  { %v294_v37 = vadd.f32 %v293_v35, %v279_v34 }
 0x165   :  { %v295_v39 = vadd.f32 %v294_v37, %v280_v36 }
 0x167   :  { %v296_v41 = vadd.f32 %v295_v39, %v281_v38 }
 0x169   :  { %v297_v43 = vadd.f32 %v296_v41, %v282_v40 }
 0x16b   :  { %v298_v45 = vadd.f32 %v297_v43, %v283_v42 }
 0x16d   :  { %v299_v47 = vadd.f32 %v298_v45, %v284_v44 }
 0x16f   :  { %v300_v49 = vadd.f32 %v299_v47, %v285_v46 }
 0x171   :  { %v301_v51 = vadd.f32 %v300_v49, %v286_v48 }
 0x173   :  { %v302_v53 = vadd.f32 %v301_v51, %v287_v50 }
 0x175   :  { %v303_v55 = vadd.f32 %v302_v53, %v288_v52 }
 0x177   :  { %v304_v57 = vadd.f32 %v303_v55, %v289_v54 }
 0x179   :  { %v305_v59 = vadd.f32 %v304_v57, %v290_v56 }
 0x17b   :  { %v306_v60 = vadd.f32 %v305_v59, %v291_v58 }
 0x17d   :  { %v307_v61 = vrot.slane %v306_v60, 4 }
 0x17f   :  { %v308_v62 = vadd.f32 %v307_v61, %v306_v60 }
 0x181   :  { %v309_v63 = vrot.slane %v308_v62, 2 }
 0x183   :  { %v310_v0 = vadd.f32 %v309_v63, %v308_v62 }
 0x185   :  { %v311_v1 = vrot.slane %v310_v0, 1 }
 0x187   :  { %v312_v2 = vadd.f32 %v311_v1, %v310_v0 }
 0x189   :  { %313 = vst [vmem:[#allocation10] sm:$0x1] %v312_v2 }
 0x18a   :  { %601 = shalt.err (!%p598_p8)
}
 0x18b   :  { %s602_s14 = scalar_lea.hbm %s800_s4, 16 }
 0x18c   :  { %p603_p9 = scmp.ne.s32.totalorder %s800_s4, %s602_s14  ;;  %p606_p10 = scmp.lt.u32.totalorder %s602_s14, %s800_s4 }
 0x18e   :  { %p608_p11 = pnand %p606_p10, %p603_p9 }
 0x190   :  { %611 = shalt.err (!%p608_p11)
}
 0x191   :  { %345 = dma.vmem_to_hbm [thread:$0]  %s343_s11, 16, %s800_s4, [#allocation9]  }
 0x192   :  { %616 = dma.done.wait [#allocation4], 2048  }
 0x193   :  { %617 = vsyncadd [#allocation4], 4294965248 }
 0x194   :  { %618 = dma.done.wait [#allocation9], 32  }
 0x195   :  { %619 = vsyncadd [#allocation9], 4294967264 }
 0x196   :  { %355 = vsyncpa [#allocation3], 1 }
 0x197   :  { %356 = vsyncpa [#allocation6], 1 }
 0x198   :  { %357 = vsyncpa [#allocation4], 1 }
 0x199   :  { %358 = vsyncpa [#allocation9], 1 }

</bundles_post_ra>
